<compile_context>
chip_gen: v5e
topology: v5e:2x2
jax: 0.10.0
libtpu: 0.0.40
codegen_flags: <defaults>
</compile_context>

<pallas_src>
import functools

import jax
import jax.numpy as jnp
import numpy as np
from jax.experimental import pallas as pl
from jax.experimental.pallas import tpu as pltpu


def wavelet_upsample_kernel(x_ref, o_ref, *, factor):
    B, H, W = x_ref.shape
    fH, fW = factor * H, factor * W
    dt = x_ref.dtype

    # In-register scatter ("dilation") matrices — zero HBM traffic, built once per step.
    #   ur[f*i, i] = 1  -> row dilation,    shape (fH, H)
    #   sc[j, f*j] = 1  -> column dilation, shape (W, fW)
    r = jax.lax.broadcasted_iota(jnp.int32, (fH, H), 0)
    c = jax.lax.broadcasted_iota(jnp.int32, (fH, H), 1)
    ur = (r == factor * c).astype(dt)
    rw = jax.lax.broadcasted_iota(jnp.int32, (W, fW), 0)
    cw = jax.lax.broadcasted_iota(jnp.int32, (W, fW), 1)
    sc = (cw == factor * rw).astype(dt)

    # Static unroll over the images batched into this block (B is small, wrapper-chosen).
    for b in range(B):
        x = x_ref[b]                                                  # (H, W)
        # Sparse dilated upsample: up[f*i, f*j] = x[i, j], zeros elsewhere.
        t = jnp.dot(ur, x, preferred_element_type=jnp.float32)       # (fH, W)
        up = jnp.dot(t, sc, preferred_element_type=jnp.float32)      # (fH, fW)
        o_ref[b] = up.astype(o_ref.dtype)
        # Top-left quadrant overwrite (only H*W elements are rescaled / rewritten).
        o_ref[b, :H, :W] = (2.0 * x).astype(o_ref.dtype)


def wavelet_upsample(x, factor=2):
    if factor != 2:
        print("wavelet upsampling is not implemented for factors different than 2")
    N, C, H, W = x.shape
    NC = N * C
    f = factor
    x2 = x.reshape(NC, H, W)

    # Pick how many (n, c) images to batch per grid step:
    #  * stay within a conservative VMEM budget (blocks are double-buffered),
    #  * cap the static unroll,
    #  * keep >= 2 grid steps so dual-TensorCore chips (v7x) can split the grid.
    itemsize = jnp.dtype(x.dtype).itemsize
    per_img_bytes = (1 + f * f) * H * W * itemsize       # input tile + output tile
    b_cap = max(1, (12 << 20) // (2 * per_img_bytes))
    b_cap = min(b_cap, 8, NC)
    B = 1
    for cand in range(1, b_cap + 1):
        if NC % cand == 0 and (NC // cand >= 2 or NC == 1):
            B = cand
    grid = (NC // B,)

    kernel = functools.partial(wavelet_upsample_kernel, factor=f)
    out = pl.pallas_call(
        kernel,
        out_shape=jax.ShapeDtypeStruct((NC, f * H, f * W), x.dtype),
        grid=grid,
        in_specs=[pl.BlockSpec((B, H, W), lambda i: (i, 0, 0))],
        out_specs=pl.BlockSpec((B, f * H, f * W), lambda i: (i, 0, 0)),
        compiler_params=pltpu.CompilerParams(dimension_semantics=("parallel",)),
    )(x2)

    return out.reshape(N, C, f * H, f * W)


def ref_wavelet_upsample(x, factor=2):
    # Pure-JAX reference mirroring the PyTorch forward.
    N, C, H, W = x.shape
    up = jnp.zeros((N, C, factor * H, factor * W), x.dtype)
    up = up.at[:, :, ::factor, ::factor].set(x)          # conv_transpose2d with w[0,0]=1
    up = up.at[:, :, :H, :W].set(2.0 * x)                # top-left overwrite
    return up


if __name__ == "__main__":
    key = jax.random.PRNGKey(0)
    x = jax.random.normal(key, (2, 4, 16, 16), dtype=jnp.float32)

    out = wavelet_upsample(x, factor=2)
    out = jax.block_until_ready(out)

    ref = jax.block_until_ready(ref_wavelet_upsample(x, factor=2))
    assert out.shape == (2, 4, 32, 32)
    np.testing.assert_allclose(np.asarray(out), np.asarray(ref), rtol=1e-6, atol=1e-6)

    print("KERNEL_OK")
</pallas_src>

<mosaic_0001>
module attributes {stable_mosaic.version = 11 : i64} {
  func.func @wavelet_upsample_kernel(%arg0: i32, %arg1: memref<4x16x16xf32, #tpu.memory_space<vmem>>, %arg2: memref<4x32x32xf32, #tpu.memory_space<vmem>>) attributes {dimension_semantics = [#tpu.dimension_semantics<parallel>], iteration_bounds = array<i64: 2>, scalar_prefetch = 0 : i64, scratch_operands = 0 : i64, tpu.core_type = #tpu.core_type<tc>, window_params = [{transform_indices = @transform_0, window_bounds = array<i64: 4, 16, 16>}, {transform_indices = @transform_1, window_bounds = array<i64: 4, 32, 32>}]} {
    %0 = tpu.iota {dimensions = array<i32: 0>} : vector<32x16xi32>
    %1 = tpu.iota {dimensions = array<i32: 1>} : vector<32x16xi32>
    %c2_i32 = arith.constant 2 : i32
    %2 = vector.broadcast %c2_i32 : i32 to vector<32x16xi32>
    %3 = arith.muli %2, %1 : vector<32x16xi32>
    %4 = arith.cmpi eq, %0, %3 : vector<32x16xi32>
    %5 = arith.extui %4 : vector<32x16xi1> to vector<32x16xi32>
    %6 = arith.sitofp %5 : vector<32x16xi32> to vector<32x16xf32>
    %7 = tpu.iota {dimensions = array<i32: 0>} : vector<16x32xi32>
    %8 = tpu.iota {dimensions = array<i32: 1>} : vector<16x32xi32>
    %c2_i32_0 = arith.constant 2 : i32
    %9 = vector.broadcast %c2_i32_0 : i32 to vector<16x32xi32>
    %10 = arith.muli %9, %7 : vector<16x32xi32>
    %11 = arith.cmpi eq, %8, %10 : vector<16x32xi32>
    %12 = arith.extui %11 : vector<16x32xi1> to vector<16x32xi32>
    %13 = arith.sitofp %12 : vector<16x32xi32> to vector<16x32xf32>
    %c0 = arith.constant 0 : index
    %c0_1 = arith.constant 0 : index
    %c0_2 = arith.constant 0 : index
    %14 = vector.load %arg1[%c0, %c0_1, %c0_2] : memref<4x16x16xf32, #tpu.memory_space<vmem>>, vector<1x16x16xf32>
    %15 = vector.shape_cast %14 : vector<1x16x16xf32> to vector<16x16xf32>
    %cst = arith.constant dense<0.000000e+00> : vector<32x16xf32>
    %16 = tpu.matmul %6, %15, %cst {dimension_numbers = #tpu.dot_dimension_numbers<[1], [0], [0], [1], [0, 0, 1, 1], [], []>} : vector<32x16xf32>, vector<16x16xf32>, vector<32x16xf32> -> vector<32x16xf32>
    %cst_3 = arith.constant dense<0.000000e+00> : vector<32x32xf32>
    %17 = tpu.matmul %16, %13, %cst_3 {dimension_numbers = #tpu.dot_dimension_numbers<[1], [0], [0], [1], [0, 0, 1, 1], [], []>} : vector<32x16xf32>, vector<16x32xf32>, vector<32x32xf32> -> vector<32x32xf32>
    %c0_4 = arith.constant 0 : index
    %c0_5 = arith.constant 0 : index
    %c0_6 = arith.constant 0 : index
    %18 = vector.load %arg2[%c0_4, %c0_5, %c0_6] : memref<4x32x32xf32, #tpu.memory_space<vmem>>, vector<1x32x32xf32>
    %19 = vector.shape_cast %18 : vector<1x32x32xf32> to vector<32x32xf32>
    %20 = vector.shape_cast %17 : vector<32x32xf32> to vector<1x32x32xf32>
    tpu.vector_store %arg2[%c0_4, %c0_5, %c0_6], %20 {strides = array<i32>} : memref<4x32x32xf32, #tpu.memory_space<vmem>>, vector<1x32x32xf32>,
    %cst_7 = arith.constant 2.000000e+00 : f32
    %21 = vector.broadcast %cst_7 : f32 to vector<16x16xf32>
    %22 = arith.mulf %21, %15 : vector<16x16xf32>
    %c0_8 = arith.constant 0 : index
    %c0_9 = arith.constant 0 : index
    %c0_10 = arith.constant 0 : index
    %23 = vector.load %arg2[%c0_8, %c0_9, %c0_10] : memref<4x32x32xf32, #tpu.memory_space<vmem>>, vector<1x16x16xf32>
    %24 = vector.shape_cast %23 : vector<1x16x16xf32> to vector<16x16xf32>
    %25 = vector.shape_cast %22 : vector<16x16xf32> to vector<1x16x16xf32>
    tpu.vector_store %arg2[%c0_8, %c0_9, %c0_10], %25 {strides = array<i32>} : memref<4x32x32xf32, #tpu.memory_space<vmem>>, vector<1x16x16xf32>,
    %c1 = arith.constant 1 : index
    %c0_11 = arith.constant 0 : index
    %c0_12 = arith.constant 0 : index
    %26 = vector.load %arg1[%c1, %c0_11, %c0_12] : memref<4x16x16xf32, #tpu.memory_space<vmem>>, vector<1x16x16xf32>
    %27 = vector.shape_cast %26 : vector<1x16x16xf32> to vector<16x16xf32>
    %cst_13 = arith.constant dense<0.000000e+00> : vector<32x16xf32>
    %28 = tpu.matmul %6, %27, %cst_13 {dimension_numbers = #tpu.dot_dimension_numbers<[1], [0], [0], [1], [0, 0, 1, 1], [], []>} : vector<32x16xf32>, vector<16x16xf32>, vector<32x16xf32> -> vector<32x16xf32>
    %cst_14 = arith.constant dense<0.000000e+00> : vector<32x32xf32>
    %29 = tpu.matmul %28, %13, %cst_14 {dimension_numbers = #tpu.dot_dimension_numbers<[1], [0], [0], [1], [0, 0, 1, 1], [], []>} : vector<32x16xf32>, vector<16x32xf32>, vector<32x32xf32> -> vector<32x32xf32>
    %c1_15 = arith.constant 1 : index
    %c0_16 = arith.constant 0 : index
    %c0_17 = arith.constant 0 : index
    %30 = vector.load %arg2[%c1_15, %c0_16, %c0_17] : memref<4x32x32xf32, #tpu.memory_space<vmem>>, vector<1x32x32xf32>
    %31 = vector.shape_cast %30 : vector<1x32x32xf32> to vector<32x32xf32>
    %32 = vector.shape_cast %29 : vector<32x32xf32> to vector<1x32x32xf32>
    tpu.vector_store %arg2[%c1_15, %c0_16, %c0_17], %32 {strides = array<i32>} : memref<4x32x32xf32, #tpu.memory_space<vmem>>, vector<1x32x32xf32>,
    %cst_18 = arith.constant 2.000000e+00 : f32
    %33 = vector.broadcast %cst_18 : f32 to vector<16x16xf32>
    %34 = arith.mulf %33, %27 : vector<16x16xf32>
    %c1_19 = arith.constant 1 : index
    %c0_20 = arith.constant 0 : index
    %c0_21 = arith.constant 0 : index
    %35 = vector.load %arg2[%c1_19, %c0_20, %c0_21] : memref<4x32x32xf32, #tpu.memory_space<vmem>>, vector<1x16x16xf32>
    %36 = vector.shape_cast %35 : vector<1x16x16xf32> to vector<16x16xf32>
    %37 = vector.shape_cast %34 : vector<16x16xf32> to vector<1x16x16xf32>
    tpu.vector_store %arg2[%c1_19, %c0_20, %c0_21], %37 {strides = array<i32>} : memref<4x32x32xf32, #tpu.memory_space<vmem>>, vector<1x16x16xf32>,
    %c2 = arith.constant 2 : index
    %c0_22 = arith.constant 0 : index
    %c0_23 = arith.constant 0 : index
    %38 = vector.load %arg1[%c2, %c0_22, %c0_23] : memref<4x16x16xf32, #tpu.memory_space<vmem>>, vector<1x16x16xf32>
    %39 = vector.shape_cast %38 : vector<1x16x16xf32> to vector<16x16xf32>
    %cst_24 = arith.constant dense<0.000000e+00> : vector<32x16xf32>
    %40 = tpu.matmul %6, %39, %cst_24 {dimension_numbers = #tpu.dot_dimension_numbers<[1], [0], [0], [1], [0, 0, 1, 1], [], []>} : vector<32x16xf32>, vector<16x16xf32>, vector<32x16xf32> -> vector<32x16xf32>
    %cst_25 = arith.constant dense<0.000000e+00> : vector<32x32xf32>
    %41 = tpu.matmul %40, %13, %cst_25 {dimension_numbers = #tpu.dot_dimension_numbers<[1], [0], [0], [1], [0, 0, 1, 1], [], []>} : vector<32x16xf32>, vector<16x32xf32>, vector<32x32xf32> -> vector<32x32xf32>
    %c2_26 = arith.constant 2 : index
    %c0_27 = arith.constant 0 : index
    %c0_28 = arith.constant 0 : index
    %42 = vector.load %arg2[%c2_26, %c0_27, %c0_28] : memref<4x32x32xf32, #tpu.memory_space<vmem>>, vector<1x32x32xf32>
    %43 = vector.shape_cast %42 : vector<1x32x32xf32> to vector<32x32xf32>
    %44 = vector.shape_cast %41 : vector<32x32xf32> to vector<1x32x32xf32>
    tpu.vector_store %arg2[%c2_26, %c0_27, %c0_28], %44 {strides = array<i32>} : memref<4x32x32xf32, #tpu.memory_space<vmem>>, vector<1x32x32xf32>,
    %cst_29 = arith.constant 2.000000e+00 : f32
    %45 = vector.broadcast %cst_29 : f32 to vector<16x16xf32>
    %46 = arith.mulf %45, %39 : vector<16x16xf32>
    %c2_30 = arith.constant 2 : index
    %c0_31 = arith.constant 0 : index
    %c0_32 = arith.constant 0 : index
    %47 = vector.load %arg2[%c2_30, %c0_31, %c0_32] : memref<4x32x32xf32, #tpu.memory_space<vmem>>, vector<1x16x16xf32>
    %48 = vector.shape_cast %47 : vector<1x16x16xf32> to vector<16x16xf32>
    %49 = vector.shape_cast %46 : vector<16x16xf32> to vector<1x16x16xf32>
    tpu.vector_store %arg2[%c2_30, %c0_31, %c0_32], %49 {strides = array<i32>} : memref<4x32x32xf32, #tpu.memory_space<vmem>>, vector<1x16x16xf32>,
    %c3 = arith.constant 3 : index
    %c0_33 = arith.constant 0 : index
    %c0_34 = arith.constant 0 : index
    %50 = vector.load %arg1[%c3, %c0_33, %c0_34] : memref<4x16x16xf32, #tpu.memory_space<vmem>>, vector<1x16x16xf32>
    %51 = vector.shape_cast %50 : vector<1x16x16xf32> to vector<16x16xf32>
    %cst_35 = arith.constant dense<0.000000e+00> : vector<32x16xf32>
    %52 = tpu.matmul %6, %51, %cst_35 {dimension_numbers = #tpu.dot_dimension_numbers<[1], [0], [0], [1], [0, 0, 1, 1], [], []>} : vector<32x16xf32>, vector<16x16xf32>, vector<32x16xf32> -> vector<32x16xf32>
    %cst_36 = arith.constant dense<0.000000e+00> : vector<32x32xf32>
    %53 = tpu.matmul %52, %13, %cst_36 {dimension_numbers = #tpu.dot_dimension_numbers<[1], [0], [0], [1], [0, 0, 1, 1], [], []>} : vector<32x16xf32>, vector<16x32xf32>, vector<32x32xf32> -> vector<32x32xf32>
    %c3_37 = arith.constant 3 : index
    %c0_38 = arith.constant 0 : index
    %c0_39 = arith.constant 0 : index
    %54 = vector.load %arg2[%c3_37, %c0_38, %c0_39] : memref<4x32x32xf32, #tpu.memory_space<vmem>>, vector<1x32x32xf32>
    %55 = vector.shape_cast %54 : vector<1x32x32xf32> to vector<32x32xf32>
    %56 = vector.shape_cast %53 : vector<32x32xf32> to vector<1x32x32xf32>
    tpu.vector_store %arg2[%c3_37, %c0_38, %c0_39], %56 {strides = array<i32>} : memref<4x32x32xf32, #tpu.memory_space<vmem>>, vector<1x32x32xf32>,
    %cst_40 = arith.constant 2.000000e+00 : f32
    %57 = vector.broadcast %cst_40 : f32 to vector<16x16xf32>
    %58 = arith.mulf %57, %51 : vector<16x16xf32>
    %c3_41 = arith.constant 3 : index
    %c0_42 = arith.constant 0 : index
    %c0_43 = arith.constant 0 : index
    %59 = vector.load %arg2[%c3_41, %c0_42, %c0_43] : memref<4x32x32xf32, #tpu.memory_space<vmem>>, vector<1x16x16xf32>
    %60 = vector.shape_cast %59 : vector<1x16x16xf32> to vector<16x16xf32>
    %61 = vector.shape_cast %58 : vector<16x16xf32> to vector<1x16x16xf32>
    tpu.vector_store %arg2[%c3_41, %c0_42, %c0_43], %61 {strides = array<i32>} : memref<4x32x32xf32, #tpu.memory_space<vmem>>, vector<1x16x16xf32>,
    return
  }
  func.func @transform_0(%arg0: i32) -> (i32, i32, i32) {
    %c0_i32 = arith.constant 0 : i32
    %c0_i32_0 = arith.constant 0 : i32
    %c0_i32_1 = arith.constant 0 : i32
    return %arg0, %c0_i32, %c0_i32_0 : i32, i32, i32
  }
  func.func @transform_1(%arg0: i32) -> (i32, i32, i32) {
    %c0_i32 = arith.constant 0 : i32
    %c0_i32_0 = arith.constant 0 : i32
    %c0_i32_1 = arith.constant 0 : i32
    return %arg0, %c0_i32, %c0_i32_0 : i32, i32, i32
  }
}

</mosaic_0001>

<bundles_post_ra>
// kernel: tpu_custom_call.1
= control target key start
LH: loop header
LB: loop body
LE: loop exit
PB: predicated region body
PF: predicated region fallthrough
CT: control target
= control target key end

     0   :  { %6 = vsyncpa [#allocation3], 0  ;;  %s1109_s0 = inlined_call_operand.hbm [shape: f32[8,16,16], index: 0, kind: input, shape index: {}]   ;;  %s1110_s1 = inlined_call_operand.hbm [shape: f32[8,32,32], index: 1, kind: output, shape index: {}]  }
   0x1   :  { %8 = vsyncpa [#allocation3 + $0x1], 0 }
   0x2   :  { %9 = vsyncpa [#allocation4], 0 }
   0x3   :  { %11 = vsyncpa [#allocation4 + $0x1], 0  ;;  %s854_s6 = smov 0   ;;  %s856_s7 = smov 0  }
   0x4   :  { %s858_s8 = smov 0   ;;  %s860_s9 = smov 0  }
   0x5 LB: > { %s875_s10 = sadd.s32 4294967295, %s836_s9   ;;  %s598_s11 = sadd.s32 4294967294, %s836_s9   ;;  %s836_s9 = sphi %s860_s9, %s1122_s9   ;;  %s832_s8 = sphi %s858_s8, %s1121_s8   ;;  %s828_s7 = sphi %s856_s7, %s1120_s7   ;;  %s824_s6 = sphi %s854_s6, %s1119_s6  }
   0x6   : > { %s879_s12 = sadd.s32 1, %s836_s9   ;;  %s24_s13 = sadd.s32 1, %s832_s8 }
   0x7   : > { %s21_s14 = ssub.s32 %s836_s9, %s879_s12  ;;  %p31_p0 = scmp.ne.s32.totalorder %s832_s8, %s828_s7 }
   0x8   : > { %p22_p1 = scmp.eq.s32.totalorder %s21_s14, 0  ;;  %p32_p2 = scmp.eq.s32.totalorder %s836_s9, 0 }
   0x9   : > { %p37_p3 = scmp.ne.s32.totalorder %s828_s7, %s824_s6  ;;  %p38_p4 = scmp.eq.s32.totalorder %s875_s10, 0 }
   0xa   : > { %s891_s15 = scalar_select %p22_p1, %s832_s8, %s24_s13  }
   0xb   : > { %p893_p5 = por %p32_p2, %p31_p0  ;;  %p897_p6 = por %p38_p4, %p37_p3 }
   0xc   : > { %p61_p7 = scmp.eq.s32.totalorder %s875_s10, 1  ;;  %p67_p8 = scmp.eq.s32.totalorder %s598_s11, 1 }
   0xd   : > { %p700_p10 = scmp.lt.s32.totalorder %s836_s9, 2  ;;  %s87_s20 = sand.u32 1, %s832_s8  }
   0xe   : > { %p904_p11 = por %p61_p7, %p31_p0  ;;  %p908_p12 = por %p67_p8, %p37_p3 }
   0xf   : > { %s685_s21 = sshll.u32 %s836_s9, 6  ;;  %s601_s22 = sshll.u32 %s87_s20, 6 }
  0x10   : > { %s97_s25 = scalar_lea.hbm %s1109_s0, %s685_s21  ;;  %s91_s27 = scalar_lea.vmem [#allocation2], %s601_s22 }
  0x11   : > { %s98_s26 = sshll.u32 %s97_s25, 4  ;;  %s100_s28 = sshll.u32 %s91_s27, 4  ;;  %s99_s26 = int_to_ptr.hbm [resolvable:$true] %s98_s26  ;;  %s101_s28 = int_to_ptr.vmem [resolvable:$true] %s100_s28 }
  0x12   : > { %p919_p13 = pnand %p700_p10, %p893_p5  ;;  %p605_p0 = scmp.ge.s32.totalorder %s836_s9, 1 }
  0x13   : > { %p108_p1 = scmp.lt.s32.totalorder %s836_s9, 3  ;;  %s88_s30 = scalar_lea.sflag [#allocation3], %s87_s20 }
  0x14   : > { %s740_s2 = sshra.s32 %s99_s26, 4  ;;  %p744_p3 = pneg %p919_p13  ;;  %s741_s2 = int_to_ptr.hbm [resolvable:$true] %s740_s2 }
  0x15   : > { %s742_s3 = scalar_lea.hbm %s741_s2, 64  ;;  %s747_s11 = scalar_lea.hbm %s1109_s0, 128 }
  0x16   : > { %p743_p2 = scmp.ne.s32.totalorder %s741_s2, %s742_s3  ;;  %p748_p5 = scmp.lt.s32.totalorder %s741_s2, %s1109_s0 }
  0x17   : > { %p749_p8 = scmp.lt.s32.totalorder %s747_s11, %s742_s3 }
  0x18   : > { %p745_p4 = pnand %p744_p3, %p743_p2 }
  0x19   : > { %p750_p10 = por %p749_p8, %p748_p5 }
  0x1a   : > { %p746_p7 = pneg %p745_p4 }
  0x1c   : > { %p751_p9 = pnand %p750_p10, %p746_p7 }
  0x1e   : > { %754 = shalt.err (!%p751_p9)
}
  0x1f   : > { %s838_s16 = smov 128   ;;  %s839_s20 = smov 8  }
  0x20   : > { %695 = dma.hbm_to_vmem [thread:$0]  (!%p919_p13), %s99_s26, 1024, %s101_s28, %s88_s30, %s838_s16, %s838_s16, %s839_s20  }
  0x21   : > { %p109_p2 = pnand %p605_p0, %p108_p1 }
  0x22   : > { %s940_s21 = sand.u32 (!%p109_p2), 1, %s828_s7  }
  0x23   : > { %112 = sbr.rel (%p109_p2) target bundleno = 373 (0x175), region = 24  ;;  %s606_s22 = sshll.u32 (!%p109_p2), %s940_s21, 6 }
  0x24   : > { %s115_s23 = scalar_lea.sflag (!%p109_p2), [#allocation3], %s940_s21  ;;  %s118_s24 = scalar_lea.vmem (!%p109_p2), [#allocation2], %s606_s22 }
  0x28   : > { %815 = dma.done.wait (%p897_p6), %s115_s23, 1024  }
  0x29   : > { %817 = vsyncadd (%p897_p6), %s115_s23, 4294966272  ;;  %v140_v0 = vlaneseq  ;;  %v948_v4 = vld [vmem:[%s118_s24 + $0x18] sm:$0xff]  ;;  %v950_v5 = vld [vmem:[%s118_s24 + $0x10] sm:$0xff]  ;;  %v840_v6 = vmov 0.0   ;;  %vm170_vm1 = vcmask 130048   ;;  %v841_v22 = vmov 1.0  }
  0x2a   : > { %279 = vmatpush.msra.mxu2 %v948_v4  ;;  %v953_v8 = vld [vmem:[%s118_s24 + $0x8] sm:$0xff]  ;;  %v955_v9 = vld [vmem:[%s118_s24] sm:$0xff]  ;;  %v957_v10 = vld [vmem:[%s118_s24 + $0x38] sm:$0xff]  ;;  %s607_s17 = sshll.u32 %s940_s21, 7  ;;  %vm253_vm7 = vcmask 261120   ;;  %v340_v44 = vmul.f32 2.0, %v950_v5 }
  0x2b   : > { %v141_v1 = vshrl.u32 %v140_v0, 7  ;;  %v146_v2 = vand.u32 127, %v140_v0  ;;  %197 = vmatpush.msra.mxu0 %v953_v8  ;;  %v961_v12 = vld [vmem:[%s118_s24 + $0x28] sm:$0xff]  ;;  %v965_v13 = vld [vmem:[%s118_s24 + $0x30] sm:$0xff]  ;;  %v969_v14 = vld [vmem:[%s118_s24 + $0x20] sm:$0xff]  ;;  %v258_v40 = vmul.f32 2.0, %v955_v9 }
  0x2c   : > { %280 = vmatpush.msra.mxu2 %v950_v5  ;;  %s1018_s25 = scalar_lea.vmem [#allocation5], %s607_s17  ;;  %v259_v42 = vmul.f32 2.0, %v953_v8  ;;  %v341_v47 = vmul.f32 2.0, %v948_v4  ;;  %v422_v51 = vmul.f32 2.0, %v969_v14  ;;  %v423_v54 = vmul.f32 2.0, %v961_v12  ;;  %s687_s26 = sshll.u32 %s875_s10, 7 }
  0x2d   : > { %v147_v3 = vmul.u32 2, %v146_v2  ;;  %v142_v11 = vadd.s32 8, %v141_v1  ;;  %198 = vmatpush.msra.mxu0 %v955_v9  ;;  %v143_v16 = vadd.s32 16, %v141_v1  ;;  %v144_v18 = vadd.s32 24, %v141_v1  ;;  %s521_s29 = scalar_lea.hbm %s1110_s1, %s687_s26  ;;  %s522_s30 = sshll.u32 %s1018_s25, 4  ;;  %s523_s30 = int_to_ptr.vmem [resolvable:$true] %s522_s30 }
  0x2e   : > { %443 = vmatpush.msrb.mxu2 %v957_v10  ;;  %v160_v23 = vmul.u32 2, %v141_v1  ;;  %v504_v56 = vmul.f32 2.0, %v965_v13  ;;  %v505_v59 = vmul.f32 2.0, %v957_v10  ;;  %s524_s2 = sshll.u32 %s521_s29, 4  ;;  %s509_s3 = scalar_lea.sflag [#allocation4], %s940_s21  ;;  %s525_s2 = int_to_ptr.hbm [resolvable:$true] %s524_s2 }
  0x2f   : > { %vm148_vm0 = vcmp.eq.s32.totalorder %v141_v1, %v147_v3  ;;  %vm149_vm2 = vcmp.eq.s32.totalorder %v142_v11, %v147_v3  ;;  %361 = vmatpush.msrb.mxu0 %v961_v12  ;;  %vm150_vm3 = vcmp.eq.s32.totalorder %v143_v16, %v147_v3  ;;  %vm151_vm4 = vcmp.eq.s32.totalorder %v144_v18, %v147_v3  ;;  %s784_s4 = sshra.s32 %s525_s2, 4  ;;  %s790_s13 = scalar_lea.hbm %s1110_s1, 256  ;;  %s785_s4 = int_to_ptr.hbm [resolvable:$true] %s784_s4 }
  0x30   : > { %v608_v7 = vsel %vm148_vm0, 1.0, %v840_v6  ;;  %444 = vmatpush.msrb.mxu2 %v965_v13  ;;  %v609_v15 = vsel %vm149_vm2, 1.0, %v840_v6  ;;  %v610_v17 = vsel %vm150_vm3, 1.0, %v840_v6  ;;  %v611_v19 = vsel %vm151_vm4, 1.0, %v840_v6  ;;  %s786_s10 = scalar_lea.hbm %s785_s4, 128  ;;  %p791_p0 = scmp.lt.s32.totalorder %s785_s4, %s1110_s1 }
  0x31   : > { %626 = vmatmul.msk.f32.vlgmr.msra.gmra.mxu2 %vm170_vm1, %v608_v7  ;;  %614 = vmatmul.msk.f32.vlgmr.msra.gmra.mxu0 %vm170_vm1, %v608_v7  ;;  %v161_v20 = vmul.u32 2, %v142_v11  ;;  %vm162_vm6 = vcmp.eq.s32.totalorder %v146_v2, %v160_v23  ;;  %p787_p6 = scmp.ne.s32.totalorder %s785_s4, %s786_s10  ;;  %p792_p1 = scmp.lt.s32.totalorder %s790_s13, %s786_s10 }
  0x32   : > { %362 = vmatpush.msrb.mxu0 %v969_v14 }
  0x33   : > { %vm980_vm5 = vcmp.eq.s32.totalorder %v146_v2, %v161_v20  ;;  %p788_p9 = pnand %p787_p6, %p904_p11  ;;  %p793_p3 = por %p792_p1, %p791_p0 }
  0x34   : > { %630 = vmatpush.msk.msra.mxu3 %vm980_vm5, %v841_v22  ;;  %618 = vmatpush.msk.msra.mxu1 %vm980_vm5, %v841_v22 }
  0x35   : > { %p789_p13 = pneg %p788_p9 }
  0x36   : > { %631 = vmatpush.msk.msra.mxu3 %vm162_vm6, %v841_v22  ;;  %619 = vmatpush.msk.msra.mxu1 %vm162_vm6, %v841_v22 }
  0x37   : > { %p794_p4 = pnand %p793_p3, %p789_p13 }
  0x38   : > { %666 = vmatpush.msk.msrb.mxu3 %vm980_vm5, %v841_v22  ;;  %648 = vmatpush.msk.msrb.mxu1 %vm980_vm5, %v841_v22 }
  0x39   : > { %627 = vmatmul.msk.f32.gmra.mxu2 %vm170_vm1, %v609_v15  ;;  %615 = vmatmul.msk.f32.gmra.mxu0 %vm170_vm1, %v609_v15 }
  0x3a   : > { %667 = vmatpush.msk.msrb.mxu3 %vm162_vm6, %v841_v22  ;;  %649 = vmatpush.msk.msrb.mxu1 %vm162_vm6, %v841_v22 }
  0x41   : > { %628 = vmatmul.msk.f32.gmra.mxu2 %vm170_vm1, %v610_v17  ;;  %616 = vmatmul.msk.f32.gmra.mxu0 %vm170_vm1, %v610_v17 }
  0x49   : > { %629 = vmatmul.msk.f32.gmra.mxu2 %vm170_vm1, %v611_v19  ;;  %617 = vmatmul.msk.f32.gmra.mxu0 %vm170_vm1, %v611_v19 }
  0x51   : > { %662 = vmatmul.msk.f32.vlgmr.msrb.gmra.mxu2 %vm170_vm1, %v608_v7  ;;  %644 = vmatmul.msk.f32.vlgmr.msrb.gmra.mxu0 %vm170_vm1, %v608_v7 }
  0x59   : > { %663 = vmatmul.msk.f32.gmra.mxu2 %vm170_vm1, %v609_v15  ;;  %645 = vmatmul.msk.f32.gmra.mxu0 %vm170_vm1, %v609_v15 }
  0x61   : > { %664 = vmatmul.msk.f32.gmra.mxu2 %vm170_vm1, %v610_v17  ;;  %646 = vmatmul.msk.f32.gmra.mxu0 %vm170_vm1, %v610_v17 }
  0x69   : > { %665 = vmatmul.msk.f32.gmra.mxu2 %vm170_vm1, %v611_v19  ;;  %647 = vmatmul.msk.f32.gmra.mxu0 %vm170_vm1, %v611_v19 }
  0xae   : > { %v200_v24 = vpop.f32.mrf.mxu0 }
  0xaf   : > { %620 = vmatmul.msk.f32.vlgmr.msra.gmra.mxu1 %vm170_vm1, %v200_v24 }
  0xb4   : > { %v282_v25 = vpop.f32.mrf.mxu2 }
  0xb5   : > { %632 = vmatmul.msk.f32.vlgmr.msra.gmra.mxu3 %vm170_vm1, %v282_v25 }
  0xb6   : > { %v203_v26 = vpop.f32.mrf.mxu0 }
  0xb7   : > { %621 = vmatmul.msk.f32.gmra.mxu1 %vm170_vm1, %v203_v26 }
  0xbc   : > { %v285_v27 = vpop.f32.mrf.mxu2 }
  0xbd   : > { %633 = vmatmul.msk.f32.gmra.mxu3 %vm170_vm1, %v285_v27 }
  0xbe   : > { %v206_v28 = vpop.f32.mrf.mxu0 }
  0xbf   : > { %622 = vmatmul.msk.f32.gmra.mxu1 %vm170_vm1, %v206_v28 }
  0xc4   : > { %v288_v29 = vpop.f32.mrf.mxu2 }
  0xc5   : > { %634 = vmatmul.msk.f32.gmra.mxu3 %vm170_vm1, %v288_v29 }
  0xc6   : > { %v209_v30 = vpop.f32.mrf.mxu0 }
  0xc7   : > { %623 = vmatmul.msk.f32.gmra.mxu1 %vm170_vm1, %v209_v30 }
  0xcc   : > { %v291_v31 = vpop.f32.mrf.mxu2 }
  0xcd   : > { %635 = vmatmul.msk.f32.gmra.mxu3 %vm170_vm1, %v291_v31 }
  0xce   : > { %v364_v32 = vpop.f32.mrf.mxu0 }
  0xcf   : > { %650 = vmatmul.msk.f32.vlgmr.msrb.gmra.mxu1 %vm170_vm1, %v364_v32 }
  0xd4   : > { %v446_v33 = vpop.f32.mrf.mxu2 }
  0xd5   : > { %668 = vmatmul.msk.f32.vlgmr.msrb.gmra.mxu3 %vm170_vm1, %v446_v33 }
  0xd6   : > { %v367_v34 = vpop.f32.mrf.mxu0 }
  0xd7   : > { %651 = vmatmul.msk.f32.gmra.mxu1 %vm170_vm1, %v367_v34 }
  0xdc   : > { %v449_v35 = vpop.f32.mrf.mxu2 }
  0xdd   : > { %669 = vmatmul.msk.f32.gmra.mxu3 %vm170_vm1, %v449_v35 }
  0xde   : > { %v370_v36 = vpop.f32.mrf.mxu0 }
  0xdf   : > { %652 = vmatmul.msk.f32.gmra.mxu1 %vm170_vm1, %v370_v36 }
  0xe4   : > { %v452_v37 = vpop.f32.mrf.mxu2 }
  0xe5   : > { %670 = vmatmul.msk.f32.gmra.mxu3 %vm170_vm1, %v452_v37 }
  0xe6   : > { %v373_v38 = vpop.f32.mrf.mxu0 }
  0xe7   : > { %653 = vmatmul.msk.f32.gmra.mxu1 %vm170_vm1, %v373_v38 }
  0xec   : > { %v455_v39 = vpop.f32.mrf.mxu2 }
  0xed   : > { %671 = vmatmul.msk.f32.gmra.mxu3 %vm170_vm1, %v455_v39 }
 0x12c   : > { %v241_v41 = vpop.f32.mrf.mxu1 }
 0x12d   : > { %254 = vst.msk [vmem:[%s1018_s25] sm:$0xff] %vm253_vm7, %v241_v41 }
 0x12e   : > { %260 = vst.msk [vmem:[%s1018_s25] sm:$0xff] %vm170_vm1, %v258_v40 }
 0x134   : > { %v244_v43 = vpop.f32.mrf.mxu1 }
 0x135   : > { %255 = vst.msk [vmem:[%s1018_s25 + $0x8] sm:$0xff] %vm253_vm7, %v244_v43 }
 0x136   : > { %261 = vst.msk [vmem:[%s1018_s25 + $0x8] sm:$0xff] %vm170_vm1, %v259_v42 }
 0x138   : > { %v323_v45 = vpop.f32.mrf.mxu3 }
 0x139   : > { %636 = vst.msk [vmem:[%s1018_s25 + $0x20] sm:$0xff] %vm253_vm7, %v323_v45 }
 0x13a   : > { %640 = vst.msk [vmem:[%s1018_s25 + $0x20] sm:$0xff] %vm170_vm1, %v340_v44 }
 0x13c   : > { %v247_v46 = vpop.f32.mrf.mxu1 }
 0x13d   : > { %256 = vst.msk [vmem:[%s1018_s25 + $0x10] sm:$0xff] %vm253_vm7, %v247_v46 }
 0x140   : > { %v326_v48 = vpop.f32.mrf.mxu3 }
 0x141   : > { %637 = vst.msk [vmem:[%s1018_s25 + $0x28] sm:$0xff] %vm253_vm7, %v326_v48 }
 0x142   : > { %641 = vst.msk [vmem:[%s1018_s25 + $0x28] sm:$0xff] %vm170_vm1, %v341_v47 }
 0x144   : > { %v250_v49 = vpop.f32.mrf.mxu1 }
 0x145   : > { %257 = vst.msk [vmem:[%s1018_s25 + $0x18] sm:$0xff] %vm253_vm7, %v250_v49 }
 0x148   : > { %v329_v50 = vpop.f32.mrf.mxu3 }
 0x149   : > { %638 = vst.msk [vmem:[%s1018_s25 + $0x30] sm:$0xff] %vm253_vm7, %v329_v50 }
 0x14c   : > { %v405_v52 = vpop.f32.mrf.mxu1 }
 0x14d   : > { %654 = vst.msk [vmem:[%s1018_s25 + $0x40] sm:$0xff] %vm253_vm7, %v405_v52 }
 0x14e   : > { %658 = vst.msk [vmem:[%s1018_s25 + $0x40] sm:$0xff] %vm170_vm1, %v422_v51 }
 0x150   : > { %v332_v53 = vpop.f32.mrf.mxu3 }
 0x151   : > { %639 = vst.msk [vmem:[%s1018_s25 + $0x38] sm:$0xff] %vm253_vm7, %v332_v53 }
 0x154   : > { %v408_v55 = vpop.f32.mrf.mxu1 }
 0x155   : > { %655 = vst.msk [vmem:[%s1018_s25 + $0x48] sm:$0xff] %vm253_vm7, %v408_v55 }
 0x156   : > { %659 = vst.msk [vmem:[%s1018_s25 + $0x48] sm:$0xff] %vm170_vm1, %v423_v54 }
 0x158   : > { %v487_v57 = vpop.f32.mrf.mxu3 }
 0x159   : > { %672 = vst.msk [vmem:[%s1018_s25 + $0x60] sm:$0xff] %vm253_vm7, %v487_v57 }
 0x15a   : > { %676 = vst.msk [vmem:[%s1018_s25 + $0x60] sm:$0xff] %vm170_vm1, %v504_v56 }
 0x15c   : > { %v411_v58 = vpop.f32.mrf.mxu1 }
 0x15d   : > { %656 = vst.msk [vmem:[%s1018_s25 + $0x50] sm:$0xff] %vm253_vm7, %v411_v58 }
 0x160   : > { %v490_v60 = vpop.f32.mrf.mxu3 }
 0x161   : > { %673 = vst.msk [vmem:[%s1018_s25 + $0x68] sm:$0xff] %vm253_vm7, %v490_v60 }
 0x162   : > { %677 = vst.msk [vmem:[%s1018_s25 + $0x68] sm:$0xff] %vm170_vm1, %v505_v59 }
 0x164   : > { %v414_v61 = vpop.f32.mrf.mxu1 }
 0x165   : > { %657 = vst.msk [vmem:[%s1018_s25 + $0x58] sm:$0xff] %vm253_vm7, %v414_v61 }
 0x168   : > { %v493_v62 = vpop.f32.mrf.mxu3 }
 0x169   : > { %674 = vst.msk [vmem:[%s1018_s25 + $0x70] sm:$0xff] %vm253_vm7, %v493_v62 }
 0x170   : > { %v496_v63 = vpop.f32.mrf.mxu3 }
 0x171   : > { %675 = vst.msk [vmem:[%s1018_s25 + $0x78] sm:$0xff] %vm253_vm7, %v496_v63 }
 0x172   : > { %797 = shalt.err (!%p794_p4)
}
 0x173   : > { %s842_s20 = smov 128   ;;  %s843_s21 = smov 8  }
 0x174   : > { %690 = dma.vmem_to_hbm [thread:$0]  (%p904_p11), %s523_s30, 2048, %s525_s2, %s509_s3, %s842_s20, %s842_s20, %s843_s21  }
 0x175 PF: > { %s539_s22 = sand.u32 1, %s824_s6   ;;  %p1118_p7 = scmp.ge.s32.totalorder %s836_s9, 2 }
 0x176   : > { %s540_s23 = scalar_lea.sflag [#allocation4], %s539_s22 }
 0x177   : > { %p697_p5 = pnand %p1118_p7, %p908_p12 }
 0x179   : > { %p698_p8 = pneg %p697_p5 }
 0x17b   : > { %819 = dma.done.wait (%p698_p8), %s540_s23, 2048  }
 0x17c   : > { %821 = vsyncadd (%p698_p8), %s540_s23, 4294965248  ;;  %p14_p10 = scmp.ge.s32.totalorder %s879_s12, 4   ;;  %s1119_s6 = smov %s828_s7 }
 0x17d   : > { %s1120_s7 = smov %s832_s8  ;;  %s1121_s8 = smov %s891_s15 }
 0x17e   : > { %s1122_s9 = smov %s879_s12  ;;  %16 = sbr.rel (!%p14_p10) target bundleno = 5 (0x5), region = 75 }
 0x183   :  { %546 = vsyncpa [#allocation3], 1 }
 0x184   :  { %548 = vsyncpa [#allocation3 + $0x1], 1 }
 0x185   :  { %549 = vsyncpa [#allocation4], 1 }
 0x186   :  { %551 = vsyncpa [#allocation4 + $0x1], 1 }

</bundles_post_ra>
